<compile_context>
chip_gen: v5e
topology: v5e:2x2
jax: 0.10.0
libtpu: 0.0.40
codegen_flags: <defaults>
</compile_context>

<pallas_src>
import functools

import jax
import jax.numpy as jnp
import numpy as np
from jax.experimental import pallas as pl
from jax.experimental.pallas import tpu as pltpu


def residual_block_kernel(alpha_ref, beta_ref,              # SMEM scalars
                          x_ref, w1r_ref, b1r_ref,          # x tile, fused [W1|Wr], [b1|br]
                          w2_ref, b2_ref,                    # fc2
                          o_ref, *, f_out):
    alpha = alpha_ref[0]
    beta = beta_ref[0]                                       # already clamped in wrapper

    x = x_ref[...]                                           # (tb, F_in_p)

    # One wide matmul for fc1 and fc_residual: x @ [W1 | Wr] + [b1 | br]
    hr = jnp.dot(x, w1r_ref[...],
                 preferred_element_type=jnp.float32) + b1r_ref[...]   # (tb, 2*F_out_p)

    h = jnp.tanh(alpha * hr[:, :f_out])                      # adaptive activation on fc1 path
    r = hr[:, f_out:]                                        # residual path (no activation)

    # fc2
    h = jnp.dot(h.astype(w2_ref.dtype), w2_ref[...],
                preferred_element_type=jnp.float32) + b2_ref[...]

    # gated residual combine + adaptive activation
    y = beta * h + (1.0 - beta) * r
    o_ref[...] = jnp.tanh(alpha * y).astype(o_ref.dtype)


def _round_up(n, m):
    return (n + m - 1) // m * m


def _pad2(a, rows, cols):
    return jnp.pad(a, ((0, rows - a.shape[0]), (0, cols - a.shape[1])))


def residual_block(x, params, *, tb=256, use_bf16=False):
    """x: (B, F_in) float32. params: dict with w1,b1,w2,b2,wr,br,alpha,beta.

    Weights are stored pre-transposed as (fan_in, fan_out)."""
    B, F_in = x.shape
    F_out = params["w1"].shape[1]

    # Lane-dense padding (multiples of 128 on feature axes) and batch tiling.
    F_in_p = _round_up(F_in, 128)
    F_out_p = _round_up(F_out, 128)
    tb_eff = min(tb, _round_up(B, 8))
    B_p = _round_up(B, tb_eff)

    cdt = jnp.bfloat16 if use_bf16 else jnp.float32

    # Zero-padded operands. Padded input rows/cols are zero so they contribute
    # nothing; padded output columns come out exactly 0 and are sliced off.
    # Padded batch rows produce finite (tanh-bounded) junk that is sliced off.
    x_p = _pad2(x, B_p, F_in_p).astype(cdt)
    w1r = jnp.concatenate(
        [_pad2(params["w1"], F_in_p, F_out_p),
         _pad2(params["wr"], F_in_p, F_out_p)], axis=1).astype(cdt)
    b1r = jnp.concatenate(
        [_pad2(params["b1"], 1, F_out_p),
         _pad2(params["br"], 1, F_out_p)], axis=1).astype(jnp.float32)
    w2_p = _pad2(params["w2"], F_out_p, F_out_p).astype(cdt)
    b2_p = _pad2(params["b2"], 1, F_out_p).astype(jnp.float32)

    # Scalar prep hoisted out of the kernel.
    alpha = params["alpha"].reshape((1,)).astype(jnp.float32)
    beta = jnp.clip(params["beta"].reshape((1,)), 0.01, 1.0).astype(jnp.float32)

    grid = (B_p // tb_eff,)
    smem = pl.BlockSpec(memory_space=pltpu.MemorySpace.SMEM)
    resident = lambda shape: pl.BlockSpec(shape, lambda i: (0, 0))   # weights stay in VMEM

    out = pl.pallas_call(
        functools.partial(residual_block_kernel, f_out=F_out_p),
        out_shape=jax.ShapeDtypeStruct((B_p, F_out_p), jnp.float32),
        grid=grid,
        in_specs=[
            smem,                                             # alpha
            smem,                                             # beta (clamped)
            pl.BlockSpec((tb_eff, F_in_p), lambda i: (i, 0)),  # x tile over batch
            resident((F_in_p, 2 * F_out_p)),                  # [W1 | Wr]
            resident((1, 2 * F_out_p)),                       # [b1 | br]
            resident((F_out_p, F_out_p)),                     # W2
            resident((1, F_out_p)),                           # b2
        ],
        out_specs=pl.BlockSpec((tb_eff, F_out_p), lambda i: (i, 0)),
        compiler_params=pltpu.CompilerParams(
            dimension_semantics=("parallel",)),
    )(alpha, beta, x_p, w1r, b1r, w2_p, b2_p)

    return out[:B, :F_out]


def _xavier_uniform(key, fan_in, fan_out):
    # matches nn.init.xavier_uniform_ for a (fan_out, fan_in) weight; stored
    # already transposed as (fan_in, fan_out).
    limit = float(np.sqrt(6.0 / (fan_in + fan_out)))
    return jax.random.uniform(key, (fan_in, fan_out), jnp.float32, -limit, limit)


def _linear_bias(key, fan_in, fan_out):
    # PyTorch nn.Linear default bias init: U(-1/sqrt(fan_in), 1/sqrt(fan_in))
    bound = float(1.0 / np.sqrt(fan_in))
    return jax.random.uniform(key, (1, fan_out), jnp.float32, -bound, bound)


def init_params(key, input_size, output_size):
    k = jax.random.split(key, 6)
    return {
        "w1": _xavier_uniform(k[0], input_size, output_size),
        "b1": _linear_bias(k[1], input_size, output_size),
        "w2": _xavier_uniform(k[2], output_size, output_size),
        "b2": _linear_bias(k[3], output_size, output_size),
        "wr": _xavier_uniform(k[4], input_size, output_size),
        "br": _linear_bias(k[5], input_size, output_size),
        "alpha": jnp.array([0.9], dtype=jnp.float32),   # AdaptiveActivation.alpha
        "beta": jnp.array([0.9], dtype=jnp.float32),    # ResidualBlock.beta
    }


def residual_block_ref(x, p):
    alpha = p["alpha"][0]
    beta = jnp.clip(p["beta"][0], 0.01, 1.0)
    h = jnp.tanh(alpha * (x @ p["w1"] + p["b1"]))
    h = h @ p["w2"] + p["b2"]
    r = x @ p["wr"] + p["br"]
    return jnp.tanh(alpha * (beta * h + (1.0 - beta) * r))


if __name__ == "__main__":
    key = jax.random.PRNGKey(0)
    kx, kp, kx2, kp2 = jax.random.split(key, 4)

    # Small shapes consistent with the module.
    B, input_size, output_size = 8, 32, 32
    x = jax.random.normal(kx, (B, input_size), dtype=jnp.float32)
    params = init_params(kp, input_size, output_size)

    out = jax.block_until_ready(residual_block(x, params))
    ref = residual_block_ref(x, params)
    np.testing.assert_allclose(np.asarray(out), np.asarray(ref),
                               rtol=1e-5, atol=1e-5)

    # Larger, lane-dense case: multi-step parallel grid, 256-row batch tiles.
    B2, feat2 = 512, 128
    x2 = jax.random.normal(kx2, (B2, feat2), dtype=jnp.float32)
    params2 = init_params(kp2, feat2, feat2)

    out2 = jax.block_until_ready(residual_block(x2, params2, tb=256))
    ref2 = residual_block_ref(x2, params2)
    np.testing.assert_allclose(np.asarray(out2), np.asarray(ref2),
                               rtol=1e-4, atol=1e-4)

    print("KERNEL_OK")
</pallas_src>

<mosaic_0001>
module attributes {stable_mosaic.version = 11 : i64} {
  func.func @residual_block_kernel(%arg0: i32, %arg1: memref<1xf32, #tpu.memory_space<smem>>, %arg2: memref<1xf32, #tpu.memory_space<smem>>, %arg3: memref<8x128xf32, #tpu.memory_space<vmem>>, %arg4: memref<128x256xf32, #tpu.memory_space<vmem>>, %arg5: memref<1x256xf32, #tpu.memory_space<vmem>>, %arg6: memref<128x128xf32, #tpu.memory_space<vmem>>, %arg7: memref<1x128xf32, #tpu.memory_space<vmem>>, %arg8: memref<8x128xf32, #tpu.memory_space<vmem>>) attributes {dimension_semantics = [#tpu.dimension_semantics<parallel>], iteration_bounds = array<i64: 1>, scalar_prefetch = 0 : i64, scratch_operands = 0 : i64, tpu.core_type = #tpu.core_type<tc>, window_params = [{transform_indices = @transform_0, window_bounds = array<i64: 1>}, {transform_indices = @transform_1, window_bounds = array<i64: 1>}, {transform_indices = @transform_2, window_bounds = array<i64: 8, 128>}, {pipeline_mode = #tpu.pipeline_mode<synchronous>, transform_indices = @transform_3, window_bounds = array<i64: 128, 256>}, {pipeline_mode = #tpu.pipeline_mode<synchronous>, transform_indices = @transform_4, window_bounds = array<i64: 1, 256>}, {pipeline_mode = #tpu.pipeline_mode<synchronous>, transform_indices = @transform_5, window_bounds = array<i64: 128, 128>}, {pipeline_mode = #tpu.pipeline_mode<synchronous>, transform_indices = @transform_6, window_bounds = array<i64: 1, 128>}, {transform_indices = @transform_7, window_bounds = array<i64: 8, 128>}]} {
    %c0 = arith.constant 0 : index
    %0 = memref.load %arg1[%c0] : memref<1xf32, #tpu.memory_space<smem>>
    %c0_0 = arith.constant 0 : index
    %1 = memref.load %arg2[%c0_0] : memref<1xf32, #tpu.memory_space<smem>>
    %c0_1 = arith.constant 0 : index
    %c0_2 = arith.constant 0 : index
    %2 = vector.load %arg3[%c0_1, %c0_2] : memref<8x128xf32, #tpu.memory_space<vmem>>, vector<8x128xf32>
    %c0_3 = arith.constant 0 : index
    %c0_4 = arith.constant 0 : index
    %3 = vector.load %arg4[%c0_3, %c0_4] : memref<128x256xf32, #tpu.memory_space<vmem>>, vector<128x256xf32>
    %cst = arith.constant dense<0.000000e+00> : vector<8x256xf32>
    %4 = tpu.matmul %2, %3, %cst {dimension_numbers = #tpu.dot_dimension_numbers<[1], [0], [0], [1], [0, 0, 1, 1], [], []>} : vector<8x128xf32>, vector<128x256xf32>, vector<8x256xf32> -> vector<8x256xf32>
    %c0_5 = arith.constant 0 : index
    %c0_6 = arith.constant 0 : index
    %5 = vector.load %arg5[%c0_5, %c0_6] : memref<1x256xf32, #tpu.memory_space<vmem>>, vector<1x256xf32>
    %6 = vector.broadcast %5 : vector<1x256xf32> to vector<8x256xf32>
    %7 = arith.addf %4, %6 : vector<8x256xf32>
    %8 = vector.extract_strided_slice %7 {offsets = [0, 0], sizes = [8, 128], strides = [1, 1]} : vector<8x256xf32> to vector<8x128xf32>
    %9 = vector.broadcast %0 : f32 to vector<8x128xf32>
    %10 = arith.mulf %9, %8 : vector<8x128xf32>
    %11 = math.tanh %10 : vector<8x128xf32>
    %12 = vector.extract_strided_slice %7 {offsets = [0, 128], sizes = [8, 128], strides = [1, 1]} : vector<8x256xf32> to vector<8x128xf32>
    %c0_7 = arith.constant 0 : index
    %c0_8 = arith.constant 0 : index
    %13 = vector.load %arg6[%c0_7, %c0_8] : memref<128x128xf32, #tpu.memory_space<vmem>>, vector<128x128xf32>
    %cst_9 = arith.constant dense<0.000000e+00> : vector<8x128xf32>
    %14 = tpu.matmul %11, %13, %cst_9 {dimension_numbers = #tpu.dot_dimension_numbers<[1], [0], [0], [1], [0, 0, 1, 1], [], []>} : vector<8x128xf32>, vector<128x128xf32>, vector<8x128xf32> -> vector<8x128xf32>
    %c0_10 = arith.constant 0 : index
    %c0_11 = arith.constant 0 : index
    %15 = vector.load %arg7[%c0_10, %c0_11] : memref<1x128xf32, #tpu.memory_space<vmem>>, vector<1x128xf32>
    %16 = vector.broadcast %15 : vector<1x128xf32> to vector<8x128xf32>
    %17 = arith.addf %14, %16 : vector<8x128xf32>
    %18 = vector.broadcast %1 : f32 to vector<8x128xf32>
    %19 = arith.mulf %18, %17 : vector<8x128xf32>
    %cst_12 = arith.constant 1.000000e+00 : f32
    %20 = arith.subf %cst_12, %1 : f32
    %21 = vector.broadcast %20 : f32 to vector<8x128xf32>
    %22 = arith.mulf %21, %12 : vector<8x128xf32>
    %23 = arith.addf %19, %22 : vector<8x128xf32>
    %24 = vector.broadcast %0 : f32 to vector<8x128xf32>
    %25 = arith.mulf %24, %23 : vector<8x128xf32>
    %26 = math.tanh %25 : vector<8x128xf32>
    %c0_13 = arith.constant 0 : index
    %c0_14 = arith.constant 0 : index
    %27 = vector.load %arg8[%c0_13, %c0_14] : memref<8x128xf32, #tpu.memory_space<vmem>>, vector<8x128xf32>
    tpu.vector_store %arg8[%c0_13, %c0_14], %26 {strides = array<i32>} : memref<8x128xf32, #tpu.memory_space<vmem>>, vector<8x128xf32>,
    return
  }
  func.func @transform_0(%arg0: i32) -> i32 {
    %c0_i32 = arith.constant 0 : i32
    %c0_i32_0 = arith.constant 0 : i32
    return %c0_i32 : i32
  }
  func.func @transform_1(%arg0: i32) -> i32 {
    %c0_i32 = arith.constant 0 : i32
    %c0_i32_0 = arith.constant 0 : i32
    return %c0_i32 : i32
  }
  func.func @transform_2(%arg0: i32) -> (i32, i32) {
    %c0_i32 = arith.constant 0 : i32
    %c0_i32_0 = arith.constant 0 : i32
    return %arg0, %c0_i32 : i32, i32
  }
  func.func @transform_3(%arg0: i32) -> (i32, i32) {
    %c0_i32 = arith.constant 0 : i32
    %c0_i32_0 = arith.constant 0 : i32
    %c0_i32_1 = arith.constant 0 : i32
    return %c0_i32, %c0_i32_0 : i32, i32
  }
  func.func @transform_4(%arg0: i32) -> (i32, i32) {
    %c0_i32 = arith.constant 0 : i32
    %c0_i32_0 = arith.constant 0 : i32
    %c0_i32_1 = arith.constant 0 : i32
    return %c0_i32, %c0_i32_0 : i32, i32
  }
  func.func @transform_5(%arg0: i32) -> (i32, i32) {
    %c0_i32 = arith.constant 0 : i32
    %c0_i32_0 = arith.constant 0 : i32
    %c0_i32_1 = arith.constant 0 : i32
    return %c0_i32, %c0_i32_0 : i32, i32
  }
  func.func @transform_6(%arg0: i32) -> (i32, i32) {
    %c0_i32 = arith.constant 0 : i32
    %c0_i32_0 = arith.constant 0 : i32
    %c0_i32_1 = arith.constant 0 : i32
    return %c0_i32, %c0_i32_0 : i32, i32
  }
  func.func @transform_7(%arg0: i32) -> (i32, i32) {
    %c0_i32 = arith.constant 0 : i32
    %c0_i32_0 = arith.constant 0 : i32
    return %arg0, %c0_i32 : i32, i32
  }
}

</mosaic_0001>

<bundles_post_ra>
// kernel: tpu_custom_call.1
= control target key start
LH: loop header
LB: loop body
LE: loop exit
PB: predicated region body
PF: predicated region fallthrough
CT: control target
= control target key end

     0   :  { %14 = vsyncpa [#allocation5], 0  ;;  %s415_s0 = inlined_call_operand.<no memory space> [shape: f32[1], index: 0, kind: input, shape index: {}]   ;;  %s416_s1 = inlined_call_operand.<no memory space> [shape: f32[1], index: 1, kind: input, shape index: {}]   ;;  %s417_s2 = inlined_call_operand.hbm [shape: f32[8,128], index: 2, kind: input, shape index: {}]   ;;  %s418_s3 = inlined_call_operand.hbm [shape: f32[128,256], index: 3, kind: input, shape index: {}]   ;;  %s419_s4 = inlined_call_operand.vmem [shape: f32[1,256], index: 4, kind: input, shape index: {}]   ;;  %s420_s5 = inlined_call_operand.hbm [shape: f32[128,128], index: 5, kind: input, shape index: {}]   ;;  %s421_s6 = inlined_call_operand.vmem [shape: f32[1,128], index: 6, kind: input, shape index: {}]   ;;  %s422_s7 = inlined_call_operand.hbm [shape: f32[8,128], index: 7, kind: output, shape index: {}]  }
   0x1   :  { %15 = vsyncpa [#allocation8], 0  ;;  %s36_s26 = sshll.u32 %s418_s3, 4  ;;  %s37_s26 = int_to_ptr.hbm [resolvable:$true] %s36_s26 }
   0x2   :  { %16 = vsyncpa [#allocation6], 0  ;;  %s340_s27 = smov [#allocation7]   ;;  %s26_s8 = sshll.u32 %s417_s2, 4  ;;  %s27_s8 = int_to_ptr.hbm [resolvable:$true] %s26_s8 }
   0x3   :  { %s38_s28 = sshll.u32 %s340_s27, 4  ;;  %s341_s9 = smov 256   ;;  %s39_s28 = int_to_ptr.vmem [resolvable:$true] %s38_s28 }
   0x4   :  { %s342_s10 = smov 16   ;;  %s343_s11 = smov [#allocation4]  }
   0x5   :  { %44 = dma.hbm_to_vmem [thread:$0]  %s37_s26, 4096, %s39_s28, [#allocation8], %s341_s9, %s341_s9, %s342_s10  }
   0x6   :  { %s28_s12 = sshll.u32 %s343_s11, 4  ;;  %s51_s15 = sshll.u32 %s420_s5, 4  ;;  %s29_s12 = int_to_ptr.vmem [resolvable:$true] %s28_s12  ;;  %s52_s15 = int_to_ptr.hbm [resolvable:$true] %s51_s15 }
   0x7   :  { %31 = dma.hbm_to_vmem [thread:$0]  %s27_s8, 128, %s29_s12, [#allocation5]  }
   0x8   :  { %s344_s3 = smov [#allocation9]   ;;  %s345_s17 = smov 128  }
   0x9   :  { %s53_s16 = sshll.u32 %s344_s3, 4  ;;  %s346_s18 = smov 8   ;;  %s54_s16 = int_to_ptr.vmem [resolvable:$true] %s53_s16 }
   0xa   :  { %59 = dma.hbm_to_vmem [thread:$0]  %s52_s15, 2048, %s54_s16, [#allocation8], %s345_s17, %s345_s17, %s346_s18  }
   0xb   :  { %334 = dma.done.wait [#allocation5], 128  }
   0xc   :  { %335 = vsyncadd [#allocation5], 4294967168 }
   0xd   :  { %336 = dma.done.wait [#allocation8], 6144  }
   0xe   :  { %337 = vsyncadd [#allocation8], 4294961152  ;;  %v107_v0 = vld [vmem:[#allocation7 + $0xf0] sm:$0xff]  ;;  %v105_v1 = vld [vmem:[#allocation7 + $0xe0] sm:$0xff]  ;;  %v155_v52 = vstv %s415_s0  ;;  %s200_s23 = ssub.f32 1.0, %s416_s1  ;;  %v198_v62 = vstv %s416_s1  ;;  %s347_s26 = smov [#allocation10]  }
   0xf   :  { %115 = vmatpush.msra.mxu0 %v107_v0  ;;  %v103_v2 = vld [vmem:[#allocation7 + $0xd0] sm:$0xff]  ;;  %v101_v3 = vld [vmem:[#allocation7 + $0xc0] sm:$0xff]  ;;  %v173_v4 = vld [vmem:[#allocation9 + $0x78] sm:$0xff]  ;;  %s212_s27 = sshll.u32 %s347_s26, 4  ;;  %s214_s30 = sshll.u32 %s422_s7, 4  ;;  %s213_s27 = int_to_ptr.vmem [resolvable:$true] %s212_s27  ;;  %s215_s30 = int_to_ptr.hbm [resolvable:$true] %s214_s30 }
  0x10   :  { %v99_v5 = vld [vmem:[#allocation7 + $0xb0] sm:$0xff]  ;;  %178 = vmatpush.msra.mxu2 %v173_v4  ;;  %v108_v7 = vld [vmem:[#allocation7 + $0xf8] sm:$0xff]  ;;  %v171_v8 = vld [vmem:[#allocation9 + $0x68] sm:$0xff]  ;;  %v201_v60 = vstv %s200_s23 }
  0x11   :  { %116 = vmatpush.msra.mxu0 %v105_v1  ;;  %v172_v6 = vld [vmem:[#allocation9 + $0x70] sm:$0xff]  ;;  %135 = vmatpush.msra.mxu1 %v108_v7  ;;  %v106_v9 = vld [vmem:[#allocation7 + $0xe8] sm:$0xff]  ;;  %v97_v10 = vld [vmem:[#allocation7 + $0xa0] sm:$0xff] }
  0x12   :  { %179 = vmatpush.msra.mxu2 %v172_v6  ;;  %v104_v11 = vld [vmem:[#allocation7 + $0xd8] sm:$0xff]  ;;  %v170_v12 = vld [vmem:[#allocation9 + $0x60] sm:$0xff]  ;;  %v95_v13 = vld [vmem:[#allocation7 + $0x90] sm:$0xff] }
  0x13   :  { %117 = vmatpush.msra.mxu0 %v103_v2  ;;  %136 = vmatpush.msra.mxu1 %v106_v9  ;;  %v102_v14 = vld [vmem:[#allocation7 + $0xc8] sm:$0xff]  ;;  %v169_v15 = vld [vmem:[#allocation9 + $0x58] sm:$0xff]  ;;  %v93_v16 = vld [vmem:[#allocation7 + $0x80] sm:$0xff] }
  0x14   :  { %180 = vmatpush.msra.mxu2 %v171_v8  ;;  %v100_v17 = vld [vmem:[#allocation7 + $0xb8] sm:$0xff]  ;;  %v168_v18 = vld [vmem:[#allocation9 + $0x50] sm:$0xff]  ;;  %v98_v20 = vld [vmem:[#allocation7 + $0xa8] sm:$0xff] }
  0x15   :  { %118 = vmatpush.msra.mxu0 %v101_v3  ;;  %137 = vmatpush.msra.mxu1 %v104_v11  ;;  %v91_v19 = vld [vmem:[#allocation7 + $0x70] sm:$0xff]  ;;  %v167_v21 = vld [vmem:[#allocation9 + $0x48] sm:$0xff]  ;;  %v89_v22 = vld [vmem:[#allocation7 + $0x60] sm:$0xff] }
  0x16   :  { %181 = vmatpush.msra.mxu2 %v170_v12  ;;  %v96_v23 = vld [vmem:[#allocation7 + $0x98] sm:$0xff]  ;;  %v166_v24 = vld [vmem:[#allocation9 + $0x40] sm:$0xff]  ;;  %v87_v25 = vld [vmem:[#allocation7 + $0x50] sm:$0xff] }
  0x17   :  { %119 = vmatpush.msra.mxu0 %v99_v5  ;;  %138 = vmatpush.msra.mxu1 %v102_v14  ;;  %v165_v26 = vld [vmem:[#allocation9 + $0x38] sm:$0xff]  ;;  %v85_v27 = vld [vmem:[#allocation7 + $0x40] sm:$0xff]  ;;  %v164_v28 = vld [vmem:[#allocation9 + $0x30] sm:$0xff] }
  0x18   :  { %182 = vmatpush.msra.mxu2 %v169_v15  ;;  %v83_v29 = vld [vmem:[#allocation7 + $0x30] sm:$0xff]  ;;  %v81_v30 = vld [vmem:[#allocation7 + $0x20] sm:$0xff]  ;;  %v76_v33 = vld [vmem:[#allocation4] sm:$0xff] }
  0x19   :  { %120 = vmatpush.msra.mxu0 %v97_v10  ;;  %139 = vmatpush.msra.mxu1 %v100_v17  ;;  %v79_v31 = vld [vmem:[#allocation7 + $0x10] sm:$0xff]  ;;  %v77_v32 = vld [vmem:[#allocation7] sm:$0xff]  ;;  %v94_v34 = vld [vmem:[#allocation7 + $0x88] sm:$0xff] }
  0x1a   :  { %183 = vmatpush.msra.mxu2 %v168_v18  ;;  %v163_v35 = vld [vmem:[#allocation9 + $0x28] sm:$0xff]  ;;  %v92_v36 = vld [vmem:[#allocation7 + $0x78] sm:$0xff]  ;;  %v162_v37 = vld [vmem:[#allocation9 + $0x20] sm:$0xff] }
  0x1b   :  { %121 = vmatpush.msra.mxu0 %v95_v13  ;;  %140 = vmatpush.msra.mxu1 %v98_v20  ;;  %v90_v38 = vld [vmem:[#allocation7 + $0x68] sm:$0xff]  ;;  %v161_v39 = vld [vmem:[#allocation9 + $0x18] sm:$0xff]  ;;  %v160_v41 = vld [vmem:[#allocation9 + $0x10] sm:$0xff] }
  0x1c   :  { %184 = vmatpush.msra.mxu2 %v167_v21  ;;  %v88_v40 = vld [vmem:[#allocation7 + $0x58] sm:$0xff]  ;;  %v86_v42 = vld [vmem:[#allocation7 + $0x48] sm:$0xff]  ;;  %v158_v45 = vld [vmem:[#allocation9] sm:$0xff] }
  0x1d   :  { %122 = vmatpush.msra.mxu0 %v93_v16  ;;  %141 = vmatpush.msra.mxu1 %v96_v23  ;;  %v159_v43 = vld [vmem:[#allocation9 + $0x8] sm:$0xff]  ;;  %v84_v44 = vld [vmem:[#allocation7 + $0x38] sm:$0xff] }
  0x1e   :  { %185 = vmatpush.msra.mxu2 %v166_v24  ;;  %v82_v46 = vld [vmem:[#allocation7 + $0x28] sm:$0xff]  ;;  %v80_v47 = vld [vmem:[#allocation7 + $0x18] sm:$0xff] }
  0x1f   :  { %123 = vmatpush.msra.mxu0 %v91_v19  ;;  %142 = vmatpush.msra.mxu1 %v94_v34  ;;  %v78_v48 = vld [vmem:[#allocation7 + $0x8] sm:$0xff]  ;;  %v109_v49 = vld [vmem:[%s419_s4] sm:$0x3] }
  0x20   :  { %186 = vmatpush.msra.mxu2 %v165_v26  ;;  %v111_v50 = vperm.slane %v109_v49, 0  ;;  %v112_v56 = vperm.slane %v109_v49, 1  ;;  %v233_v59 = vld [vmem:[%s421_s6] ss:$0 sm:$0xff] }
  0x21   :  { %124 = vmatpush.msra.mxu0 %v89_v22  ;;  %143 = vmatpush.msra.mxu1 %v92_v36 }
  0x22   :  { %187 = vmatpush.msra.mxu2 %v164_v28 }
  0x23   :  { %125 = vmatpush.msra.mxu0 %v87_v25  ;;  %144 = vmatpush.msra.mxu1 %v90_v38 }
  0x24   :  { %188 = vmatpush.msra.mxu2 %v163_v35 }
  0x25   :  { %126 = vmatpush.msra.mxu0 %v85_v27  ;;  %145 = vmatpush.msra.mxu1 %v88_v40 }
  0x26   :  { %189 = vmatpush.msra.mxu2 %v162_v37 }
  0x27   :  { %127 = vmatpush.msra.mxu0 %v83_v29  ;;  %146 = vmatpush.msra.mxu1 %v86_v42 }
  0x28   :  { %190 = vmatpush.msra.mxu2 %v161_v39 }
  0x29   :  { %128 = vmatpush.msra.mxu0 %v81_v30  ;;  %147 = vmatpush.msra.mxu1 %v84_v44 }
  0x2a   :  { %191 = vmatpush.msra.mxu2 %v160_v41 }
  0x2b   :  { %129 = vmatpush.msra.mxu0 %v79_v31  ;;  %148 = vmatpush.msra.mxu1 %v82_v46 }
  0x2c   :  { %192 = vmatpush.msra.mxu2 %v159_v43 }
  0x2d   :  { %130 = vmatpush.msra.mxu0 %v77_v32  ;;  %149 = vmatpush.msra.mxu1 %v80_v47 }
  0x2e   :  { %131 = vmatmul.f32.vlgmr.msra.gmra.mxu0 %v76_v33  ;;  %193 = vmatpush.msra.mxu2 %v158_v45 }
  0x2f   :  { %150 = vmatpush.msra.mxu1 %v78_v48 }
  0x30   :  { %151 = vmatmul.f32.vlgmr.msra.gmra.mxu1 %v76_v33 }
  0xab   :  { %v132_v51 = vpop.f32.mrf.mxu0 }
  0xac   :  { %v133_v53 = vadd.f32 %v132_v51, %v111_v50 }
  0xad   :  { %v152_v57 = vpop.f32.mrf.mxu1 }
  0xae   :  { %v156_v54 = vmul.f32 %v155_v52, %v133_v53  ;;  %v153_v58 = vadd.f32 %v152_v57, %v112_v56 }
  0xb0   :  { %234 = vtanh.f32 %v156_v54  ;;  %v202_v63 = vmul.f32 %v201_v60, %v153_v58 }
  0xb6   :  { %v235_v55 = vpop.eup %234 }
  0xb7   :  { %194 = vmatmul.f32.vlgmr.msra.gmra.mxu2 %v235_v55 }
 0x13a   :  { %v195_v61 = vpop.f32.mrf.mxu2 }
 0x13b   :  { %v196_v0 = vadd.f32 %v233_v59, %v195_v61 }
 0x13d   :  { %v199_v1 = vmul.f32 %v198_v62, %v196_v0 }
 0x13f   :  { %v203_v2 = vadd.f32 %v202_v63, %v199_v1 }
 0x141   :  { %v204_v3 = vmul.f32 %v203_v2, %v155_v52 }
 0x143   :  { %236 = vtanh.f32 %v204_v3 }
 0x149   :  { %v237_v4 = vpop.eup %236 }
 0x14a   :  { %206 = vst [vmem:[#allocation10] sm:$0xff] %v237_v4 }
 0x14b   :  { %217 = dma.vmem_to_hbm [thread:$0]  %s213_s27, 128, %s215_s30, [#allocation6]  }
 0x14c   :  { %338 = dma.done.wait [#allocation6], 128  }
 0x14d   :  { %339 = vsyncadd [#allocation6], 4294967168 }
 0x14e   :  { %222 = vsyncpa [#allocation5], 1 }
 0x14f   :  { %223 = vsyncpa [#allocation8], 1 }
 0x150   :  { %224 = vsyncpa [#allocation6], 1 }

</bundles_post_ra>
